<compile_context>
chip_gen: v7x
topology: tpu7x:2x2x1
jax: 0.10.0
libtpu: 0.0.40
codegen_flags: <defaults>
</compile_context>

<pallas_src>
import functools

import jax
import jax.numpy as jnp
from jax.experimental import pallas as pl
from jax.experimental.pallas import tpu as pltpu


def _round_up(x: int, m: int) -> int:
    return ((x + m - 1) // m) * m


def _choose_batch_tiling(batch: int, block_b: int):
    """Pick (TB, B_pad): TB multiple of 8, remainder spread across grid steps."""
    n_steps = max(1, -(-batch // block_b))
    # Once the batch is large enough for >=1 MiB tiles per core, force grid >= 2 so
    # dimension_semantics=("parallel",) actually shards across both v7x TensorCores.
    if n_steps == 1 and batch >= 2048:
        n_steps = 2
    tb = _round_up(-(-batch // n_steps), 8)
    b_pad = _round_up(batch, tb)
    return tb, b_pad


def _tfc_head_logits_kernel(x_ref, w1_ref, b1_ref, w2_ref, b2_ref, out_ref):
    # Cast the streamed activations to bf16 on the VPU (free: huge compute slack);
    # both matmuls accumulate in f32 on the MXU, elementwise math stays f32.
    xb = x_ref[...].astype(jnp.bfloat16)
    h = jnp.dot(xb, w1_ref[...], preferred_element_type=jnp.float32)
    h = jax.nn.sigmoid(h + b1_ref[...])                          # f32 VPU/EUP
    pred = jnp.dot(h.astype(jnp.bfloat16), w2_ref[...],
                   preferred_element_type=jnp.float32) + b2_ref[...]
    # Narrow (TB, C) store: padded class lanes never leave the kernel.
    out_ref[...] = pred[:, : out_ref.shape[-1]]


def _tfc_head_argmax_kernel(x_ref, w1_ref, b1_ref, w2_ref, b2_ref, out_ref,
                            *, num_classes):
    xb = x_ref[...].astype(jnp.bfloat16)
    h = jnp.dot(xb, w1_ref[...], preferred_element_type=jnp.float32)
    h = jax.nn.sigmoid(h + b1_ref[...])
    pred = jnp.dot(h.astype(jnp.bfloat16), w2_ref[...],
                   preferred_element_type=jnp.float32) + b2_ref[...]
    # Fused argmax over the real classes; padded lanes masked so they can never win.
    lane = jax.lax.broadcasted_iota(jnp.int32, pred.shape, dimension=1)
    pred = jnp.where(lane < num_classes, pred, jnp.float32(-3.0e38))
    m = jnp.max(pred, axis=-1, keepdims=True)
    cand = jnp.where(pred == m, lane, jnp.int32(pred.shape[-1]))  # first maximal index
    out_ref[...] = jnp.min(cand, axis=-1, keepdims=True).astype(jnp.int32)


@functools.partial(jax.jit, static_argnames=("argmax_output", "block_b"))
def tfc_prediction_head(emb, w1, b1, w2, b2, argmax_output=False, block_b=2048):
    """
    emb: (B, connections, single_encoding_size) or already-flat (B, F); f32 or bf16.
    w1:  (F, 64)   b1: (64,)
    w2:  (64, C)   b2: (C,)
    Returns logits (B, C) f32, or class ids (B,) int32 if argmax_output.
    """
    B = emb.shape[0]
    x = emb.reshape(B, -1)                       # matches torch .reshape(B, -1)
    if x.dtype not in (jnp.float32, jnp.bfloat16):
        x = x.astype(jnp.float32)
    F = x.shape[1]
    H = w1.shape[1]
    C = w2.shape[1]
    C_pad = _round_up(C, 128)                    # lane-dense MXU/vreg compute width

    # Batch tiling: stream (TB, F) activation tiles, keep weights resident in VMEM.
    TB, B_pad = _choose_batch_tiling(B, block_b)
    if B_pad != B:
        # Padded rows are tiny (<= 8 per grid step) and get sliced off on return.
        x = jnp.pad(x, ((0, B_pad - B), (0, 0)))

    # Weights/biases prepared once in the wrapper (no per-grid-step casts in the kernel).
    w1_bf = w1.astype(jnp.bfloat16)
    b1_r = b1.astype(jnp.float32).reshape(1, H)
    w2_p = jnp.pad(w2.astype(jnp.bfloat16), ((0, 0), (0, C_pad - C)))
    b2_p = jnp.pad(b2.astype(jnp.float32), (0, C_pad - C)).reshape(1, C_pad)

    grid = (B_pad // TB,)
    in_specs = [
        pl.BlockSpec((TB, F), lambda i: (i, 0)),        # streamed activation tiles
        pl.BlockSpec((F, H), lambda i: (0, 0)),         # resident weights / biases
        pl.BlockSpec((1, H), lambda i: (0, 0)),
        pl.BlockSpec((H, C_pad), lambda i: (0, 0)),
        pl.BlockSpec((1, C_pad), lambda i: (0, 0)),
    ]
    weight_bytes = (w1_bf.size * 2 + w2_p.size * 2 + b1_r.size * 4 + b2_p.size * 4)

    if argmax_output:
        kernel = functools.partial(_tfc_head_argmax_kernel, num_classes=C)
        out_shape = jax.ShapeDtypeStruct((B_pad, 1), jnp.int32)
        out_spec = pl.BlockSpec((TB, 1), lambda i: (i, 0))
        out_bytes = B_pad * 4
    else:
        kernel = _tfc_head_logits_kernel
        out_shape = jax.ShapeDtypeStruct((B_pad, C), jnp.float32)
        out_spec = pl.BlockSpec((TB, C), lambda i: (i, 0))
        out_bytes = B_pad * C * 4

    cost = pl.CostEstimate(
        flops=2 * B_pad * F * H + 2 * B_pad * H * C_pad,
        transcendentals=B_pad * H,                      # sigmoid exp
        bytes_accessed=x.size * x.dtype.itemsize + weight_bytes + out_bytes,
    )

    out = pl.pallas_call(
        kernel,
        out_shape=out_shape,
        grid_spec=pltpu.PrefetchScalarGridSpec(
            num_scalar_prefetch=0,
            grid=grid,
            in_specs=in_specs,
            out_specs=out_spec,
        ),
        compiler_params=pltpu.CompilerParams(
            # Independent batch tiles -> shard across both TCs on v7x.
            dimension_semantics=("parallel",),
        ),
        cost_estimate=cost,
    )(x, w1_bf, b1_r, w2_p, b2_p)

    if argmax_output:
        return out[:B, 0]
    return out if B_pad == B else out[:B]


def init_params(key, num_classes, connections=2, single_encoding_size=128):
    """Deterministic PyTorch-style (uniform +-1/sqrt(fan_in)) initialization."""
    f_in = connections * single_encoding_size
    k1, k2, k3, k4 = jax.random.split(key, 4)
    bound1 = 1.0 / jnp.sqrt(f_in)
    bound2 = 1.0 / jnp.sqrt(64.0)
    # Stored pre-transposed relative to nn.Linear.weight: (in, out)
    w1 = jax.random.uniform(k1, (f_in, 64), jnp.float32, -bound1, bound1)
    b1 = jax.random.uniform(k2, (64,), jnp.float32, -bound1, bound1)
    w2 = jax.random.uniform(k3, (64, num_classes), jnp.float32, -bound2, bound2)
    b2 = jax.random.uniform(k4, (num_classes,), jnp.float32, -bound2, bound2)
    return w1, b1, w2, b2


if __name__ == "__main__":
    key = jax.random.PRNGKey(0)
    k_emb, k_params = jax.random.split(key)

    num_classes = 6
    connections = 2
    single_encoding_size = 128
    B = 2

    # emb as produced by the TFC backbone: (B, connections, single_encoding_size)
    emb = jax.random.normal(
        k_emb, (B, connections, single_encoding_size), dtype=jnp.float32
    )
    w1, b1, w2, b2 = init_params(
        k_params, num_classes, connections, single_encoding_size
    )

    pred = tfc_prediction_head(emb, w1, b1, w2, b2, argmax_output=False)
    pred = jax.block_until_ready(pred)

    cls = tfc_prediction_head(emb, w1, b1, w2, b2, argmax_output=True)
    cls = jax.block_until_ready(cls)

    # Pure-JAX reference matching the kernel's numerics (bf16 MXU feeds, f32 accumulate).
    x = emb.reshape(B, -1)
    xb = x.astype(jnp.bfloat16).astype(jnp.float32)
    w1b = w1.astype(jnp.bfloat16).astype(jnp.float32)
    w2b = w2.astype(jnp.bfloat16).astype(jnp.float32)
    h_ref = jax.nn.sigmoid(xb @ w1b + b1)
    ref = h_ref.astype(jnp.bfloat16).astype(jnp.float32) @ w2b + b2

    assert pred.shape == (B, num_classes)
    assert jnp.allclose(pred, ref, atol=5e-3, rtol=5e-3), float(
        jnp.max(jnp.abs(pred - ref))
    )
    assert cls.shape == (B,)
    assert jnp.array_equal(cls, jnp.argmax(ref, axis=1))

    print("KERNEL_OK")
</pallas_src>

<mosaic_0001>
module attributes {stable_mosaic.version = 11 : i64} {
  func.func @_tfc_head_logits_kernel(%arg0: i32, %arg1: memref<8x256xf32, #tpu.memory_space<vmem>>, %arg2: memref<256x64xbf16, #tpu.memory_space<vmem>>, %arg3: memref<1x64xf32, #tpu.memory_space<vmem>>, %arg4: memref<64x128xbf16, #tpu.memory_space<vmem>>, %arg5: memref<1x128xf32, #tpu.memory_space<vmem>>, %arg6: memref<8x6xf32, #tpu.memory_space<vmem>>) attributes {dimension_semantics = [#tpu.dimension_semantics<parallel>], iteration_bounds = array<i64: 1>, scalar_prefetch = 0 : i64, scratch_operands = 0 : i64, tpu.core_type = #tpu.core_type<tc>, window_params = [{transform_indices = @transform_0, window_bounds = array<i64: 8, 256>}, {pipeline_mode = #tpu.pipeline_mode<synchronous>, transform_indices = @transform_1, window_bounds = array<i64: 256, 64>}, {pipeline_mode = #tpu.pipeline_mode<synchronous>, transform_indices = @transform_2, window_bounds = array<i64: 1, 64>}, {pipeline_mode = #tpu.pipeline_mode<synchronous>, transform_indices = @transform_3, window_bounds = array<i64: 64, 128>}, {pipeline_mode = #tpu.pipeline_mode<synchronous>, transform_indices = @transform_4, window_bounds = array<i64: 1, 128>}, {transform_indices = @transform_5, window_bounds = array<i64: 8, 6>}]} {
    %c0 = arith.constant 0 : index
    %c0_0 = arith.constant 0 : index
    %0 = vector.load %arg1[%c0, %c0_0] : memref<8x256xf32, #tpu.memory_space<vmem>>, vector<8x256xf32>
    %1 = arith.truncf %0 : vector<8x256xf32> to vector<8x256xbf16>
    %c0_1 = arith.constant 0 : index
    %c0_2 = arith.constant 0 : index
    %2 = vector.load %arg2[%c0_1, %c0_2] : memref<256x64xbf16, #tpu.memory_space<vmem>>, vector<256x64xbf16>
    %cst = arith.constant dense<0.000000e+00> : vector<8x64xf32>
    %3 = tpu.matmul %1, %2, %cst {dimension_numbers = #tpu.dot_dimension_numbers<[1], [0], [0], [1], [0, 0, 1, 1], [], []>} : vector<8x256xbf16>, vector<256x64xbf16>, vector<8x64xf32> -> vector<8x64xf32>
    %c0_3 = arith.constant 0 : index
    %c0_4 = arith.constant 0 : index
    %4 = vector.load %arg3[%c0_3, %c0_4] : memref<1x64xf32, #tpu.memory_space<vmem>>, vector<1x64xf32>
    %5 = vector.broadcast %4 : vector<1x64xf32> to vector<8x64xf32>
    %6 = arith.addf %3, %5 : vector<8x64xf32>
    %7 = arith.negf %6 : vector<8x64xf32>
    %8 = math.exp %7 : vector<8x64xf32>
    %cst_5 = arith.constant 1.000000e+00 : f32
    %9 = vector.broadcast %cst_5 : f32 to vector<8x64xf32>
    %10 = arith.addf %9, %8 : vector<8x64xf32>
    %11 = arith.divf %9, %10 : vector<8x64xf32>
    %12 = arith.truncf %11 : vector<8x64xf32> to vector<8x64xbf16>
    %c0_6 = arith.constant 0 : index
    %c0_7 = arith.constant 0 : index
    %13 = vector.load %arg4[%c0_6, %c0_7] : memref<64x128xbf16, #tpu.memory_space<vmem>>, vector<64x128xbf16>
    %cst_8 = arith.constant dense<0.000000e+00> : vector<8x128xf32>
    %14 = tpu.matmul %12, %13, %cst_8 {dimension_numbers = #tpu.dot_dimension_numbers<[1], [0], [0], [1], [0, 0, 1, 1], [], []>} : vector<8x64xbf16>, vector<64x128xbf16>, vector<8x128xf32> -> vector<8x128xf32>
    %c0_9 = arith.constant 0 : index
    %c0_10 = arith.constant 0 : index
    %15 = vector.load %arg5[%c0_9, %c0_10] : memref<1x128xf32, #tpu.memory_space<vmem>>, vector<1x128xf32>
    %16 = vector.broadcast %15 : vector<1x128xf32> to vector<8x128xf32>
    %17 = arith.addf %14, %16 : vector<8x128xf32>
    %18 = vector.extract_strided_slice %17 {offsets = [0, 0], sizes = [8, 6], strides = [1, 1]} : vector<8x128xf32> to vector<8x6xf32>
    %c0_11 = arith.constant 0 : index
    %c0_12 = arith.constant 0 : index
    %19 = vector.load %arg6[%c0_11, %c0_12] : memref<8x6xf32, #tpu.memory_space<vmem>>, vector<8x6xf32>
    tpu.vector_store %arg6[%c0_11, %c0_12], %18 {strides = array<i32>} : memref<8x6xf32, #tpu.memory_space<vmem>>, vector<8x6xf32>,
    return
  }
  func.func @transform_0(%arg0: i32) -> (i32, i32) {
    %c0_i32 = arith.constant 0 : i32
    %c0_i32_0 = arith.constant 0 : i32
    return %arg0, %c0_i32 : i32, i32
  }
  func.func @transform_1(%arg0: i32) -> (i32, i32) {
    %c0_i32 = arith.constant 0 : i32
    %c0_i32_0 = arith.constant 0 : i32
    %c0_i32_1 = arith.constant 0 : i32
    return %c0_i32, %c0_i32_0 : i32, i32
  }
  func.func @transform_2(%arg0: i32) -> (i32, i32) {
    %c0_i32 = arith.constant 0 : i32
    %c0_i32_0 = arith.constant 0 : i32
    %c0_i32_1 = arith.constant 0 : i32
    return %c0_i32, %c0_i32_0 : i32, i32
  }
  func.func @transform_3(%arg0: i32) -> (i32, i32) {
    %c0_i32 = arith.constant 0 : i32
    %c0_i32_0 = arith.constant 0 : i32
    %c0_i32_1 = arith.constant 0 : i32
    return %c0_i32, %c0_i32_0 : i32, i32
  }
  func.func @transform_4(%arg0: i32) -> (i32, i32) {
    %c0_i32 = arith.constant 0 : i32
    %c0_i32_0 = arith.constant 0 : i32
    %c0_i32_1 = arith.constant 0 : i32
    return %c0_i32, %c0_i32_0 : i32, i32
  }
  func.func @transform_5(%arg0: i32) -> (i32, i32) {
    %c0_i32 = arith.constant 0 : i32
    %c0_i32_0 = arith.constant 0 : i32
    return %arg0, %c0_i32 : i32, i32
  }
}

</mosaic_0001>

<bundles_post_ra>
// kernel: tfc_prediction_head.1
= control target key start
LH: loop header
LB: loop body
LE: loop exit
PB: predicated region body
PF: predicated region fallthrough
CT: control target
= control target key end

     0   :  { %v385_v21 = vmov 0.0   ;;  %vm386_vm0 = vmmov 0   ;;  %vm246_vm1 = vcmask 523264   ;;  %vm290_vm2 = vcmask 48128   ;;  %s492_s1 = inlined_call_operand.vmem [shape: bf16[256,64], index: 1, kind: input, shape index: {}]   ;;  %s493_s0 = inlined_call_operand.vmem [shape: f32[8,256], index: 0, kind: input, shape index: {}]   ;;  %s494_s3 = inlined_call_operand.vmem [shape: bf16[64,128], index: 3, kind: input, shape index: {}]   ;;  %s495_s2 = inlined_call_operand.vmem [shape: f32[1,64], index: 2, kind: input, shape index: {}]   ;;  %s496_s4 = inlined_call_operand.vmem [shape: f32[1,128], index: 4, kind: input, shape index: {}]   ;;  %s497_s5 = inlined_call_operand.vmem [shape: f32[8,6], index: 5, kind: output, shape index: {}]  }
   0x1   :  { %v361_v0 = vld [vmem:[%s492_s1 + $0x40] sm:$0xff]   ;;  %v363_v2 = vld [vmem:[%s492_s1 + $0x48] sm:$0xff]   ;;  %v365_v4 = vld [vmem:[%s492_s1 + $0x50] sm:$0xff]   ;;  %347 = vmatprep.subr.bf16.mxu1 %v385_v21  ;;  %355 = vmatprep.mubr.msk.bf16.mxu1 %vm386_vm0, %v385_v21 }
   0x2   :  { %v362_v1 = vld [vmem:[%s492_s1] sm:$0xff]   ;;  %320 = vmatprep.subr.bf16.mxu0 %v361_v0  ;;  %v364_v3 = vld [vmem:[%s492_s1 + $0x8] sm:$0xff]   ;;  %v366_v5 = vld [vmem:[%s492_s1 + $0x10] sm:$0xff]  }
   0x3   :  { %321 = vmatpush3.bf16.msra.mxu0 %v362_v1  ;;  %v367_v6 = vld [vmem:[%s492_s1 + $0x58] sm:$0xff]   ;;  %v369_v8 = vld [vmem:[%s492_s1 + $0x60] sm:$0xff]   ;;  %v371_v10 = vld [vmem:[%s492_s1 + $0x68] sm:$0xff]  }
   0x4   :  { %322 = vmatprep.subr.bf16.mxu0 %v363_v2  ;;  %v368_v7 = vld [vmem:[%s492_s1 + $0x18] sm:$0xff]   ;;  %v370_v9 = vld [vmem:[%s492_s1 + $0x20] sm:$0xff]   ;;  %v22_v11 = vld [vmem:[%s493_s0 + $0x8] sm:$0xff] }
   0x5   :  { %v24_v12 = vpack.c.bf16 %v22_v11, %v22_v11  ;;  %v372_v13 = vld [vmem:[%s492_s1 + $0x28] sm:$0xff]   ;;  %v373_v14 = vld [vmem:[%s492_s1 + $0x70] sm:$0xff]   ;;  %v375_v16 = vld [vmem:[%s492_s1 + $0x78] sm:$0xff]  }
   0x6   :  { %v374_v15 = vld [vmem:[%s492_s1 + $0x30] sm:$0xff]   ;;  %v376_v17 = vld [vmem:[%s492_s1 + $0x38] sm:$0xff]   ;;  %v21_v18 = vld [vmem:[%s493_s0] sm:$0xff] }
   0x7   :  { %323 = vmatpush3.bf16.msra.mxu0 %v364_v3  ;;  %192 = vmatprep.mubr.bf16.mxu0 %v24_v12  ;;  %v23_v19 = vpack.c.bf16 %v21_v18, %v21_v18  ;;  %v377_v20 = vld [vmem:[%s494_s3] sm:$0xff]   ;;  %v378_v22 = vld [vmem:[%s494_s3 + $0x8] sm:$0xff]   ;;  %v379_v23 = vld [vmem:[%s494_s3 + $0x10] sm:$0xff]  }
   0x8   :  { %324 = vmatprep.subr.bf16.mxu0 %v365_v4  ;;  %348 = vmatpush3.bf16.msra.mxu1 %v377_v20  ;;  %v380_v24 = vld [vmem:[%s494_s3 + $0x18] sm:$0xff]   ;;  %v296_v26 = vld [vmem:[%s495_s2] ss:$0 sm:$0xff] }
   0x9   :  { %349 = vmatprep.subr.bf16.mxu1 %v385_v21  ;;  %v314_v37 = vld [vmem:[%s496_s4] ss:$0 sm:$0xff] }
   0xb   :  { %325 = vmatpush3.bf16.msra.mxu0 %v366_v5 }
   0xc   :  { %326 = vmatprep.subr.bf16.mxu0 %v367_v6  ;;  %350 = vmatpush3.bf16.msra.mxu1 %v378_v22 }
   0xd   :  { %351 = vmatprep.subr.bf16.mxu1 %v385_v21 }
   0xf   :  { %327 = vmatpush3.bf16.msra.mxu0 %v368_v7 }
  0x10   :  { %328 = vmatprep.subr.bf16.mxu0 %v369_v8  ;;  %352 = vmatpush3.bf16.msra.mxu1 %v379_v23 }
  0x11   :  { %353 = vmatprep.subr.bf16.mxu1 %v385_v21 }
  0x13   :  { %329 = vmatpush3.bf16.msra.mxu0 %v370_v9 }
  0x14   :  { %330 = vmatprep.subr.bf16.mxu0 %v371_v10  ;;  %354 = vmatpush3.bf16.msra.mxu1 %v380_v24 }
  0x17   :  { %331 = vmatpush3.bf16.msra.mxu0 %v372_v13 }
  0x18   :  { %332 = vmatprep.subr.bf16.mxu0 %v373_v14 }
  0x1b   :  { %333 = vmatpush3.bf16.msra.mxu0 %v374_v15 }
  0x1c   :  { %334 = vmatprep.subr.bf16.mxu0 %v375_v16 }
  0x1f   :  { %335 = vmatpush3.bf16.msra.mxu0 %v376_v17 }
  0x22   :  { %193 = vmatmul.mubr.bf16.vlgmr.msra.gmra.mrb[0].mxu0 %v23_v19 }
  0xf5   :  { %v336_v25 = vpop.f32.mrb[0].mxu0 }
  0xf6   :  { %v337_v27 = vpop.f32.mrb[1].mxu0 }
  0xf7   :  { %v338_v28 = vadd.f32 %v337_v27, %v336_v25  ;;  %v339_v29 = vpop.f32.mrb[2].mxu0 }
  0xf8   :  { %v340_v30 = vpop.f32.mrb[3].mxu0 }
  0xf9   :  { %v195_v31 = vadd.f32 %v338_v28, %v296_v26 }
  0xfb   :  { %v313_v32 = vmul.f32 -1.442695, %v195_v31 }
  0xfd   :  { %381 = vpow2.f32 %v313_v32 }
 0x107   :  { %v382_v33 = vpop.eup %381 }
 0x108   :  { %v203_v34 = vadd.f32 1.0, %v382_v33 }
 0x10a   :  { %383 = vrcp.f32 %v203_v34 }
 0x114   :  { %v384_v35 = vpop.eup %383 }
 0x115   :  { %v206_v36 = vpack.c.bf16 %v384_v35, %v384_v35 }
 0x117   :  { %356 = vmatmul.mubr.msk.bf16.vlgmr.msra.gmra.mrb[0].mxu1 %vm246_vm1, %v206_v36 }
 0x1ea   :  { %v284_v38 = vpop.f32.mrb[0].mxu1 }
 0x1eb   :  { %v285_v39 = vadd.f32 %v314_v37, %v284_v38  ;;  %v357_v40 = vpop.f32.mrb[1].mxu1 }
 0x1ec   :  { %v287_v41 = vpop.f32.mrb[2].mxu1 }
 0x1ed   :  { %291 = vst.msk [vmem:[%s497_s5] sm:$0xff] %vm290_vm2, %v285_v39  ;;  %v358_v42 = vpop.f32.mrb[3].mxu1 }

</bundles_post_ra>
